<compile_context>
chip_gen: v6e
topology: v6e:2x2x1
jax: 0.10.0
libtpu: 0.0.40
codegen_flags: <defaults>
</compile_context>

<pallas_src>
import jax
import jax.numpy as jnp
from jax.experimental import pallas as pl
from jax.experimental.pallas import tpu as pltpu


_LANE = 128
_SMALL_BYTES = 256 * 1024            # below this, skip pallas (launch cost dominates)
_TARGET_TILE_BYTES = 2 * 1024 * 1024  # per-buffer tile budget, conservative on v7x
_MIN_GRID_STEPS = 8                   # keep pipeline busy / feed both v7x TCs


def _round_up(x, m):
    return ((x + m - 1) // m) * m


def _round_down_clamped(x, m):
    return max(m, (x // m) * m)


def _msg_norm_kernel(w_ref, m_ref, o_ref):
    # w_ref:      (1, tile_f)       — weight row, broadcast across sublanes
    # m_ref/o_ref:(tile_b, tile_f)  — pure VPU elementwise multiply (mem-bound)
    o_ref[...] = m_ref[...].astype(o_ref.dtype) * w_ref[...]


def message_normalizer_2d(message: jax.Array, weight: jax.Array,
                          *, tile_b: int | None = None,
                          tile_f: int | None = None) -> jax.Array:
    """out = weight * message for message (B, F), weight (F,)."""
    B, F = message.shape
    assert weight.shape == (F,)
    out_dtype = jnp.result_type(weight.dtype, message.dtype)

    m_bytes = jnp.dtype(message.dtype).itemsize
    o_bytes = jnp.dtype(out_dtype).itemsize
    # sublane multiple for the narrowest streamed dtype (8 f32 / 16 bf16 / 32 i8)
    sub_mult = max(8, 32 // min(m_bytes, o_bytes))

    # ---- feature (lane) tiling: only split very wide F; tile_f stays a
    # multiple of 128 (or the full dim), keeping stores lane-dense. ----
    if tile_f is None:
        if F <= 2048 or F < _LANE:
            tile_f = F                                   # full dim is always legal
        else:
            tile_f = _round_down_clamped(min(F, 2048), _LANE)
    # TODO(synk): for F >= 128 but not a multiple of 128 the trailing lanes use
    # masked stores; acceptable here (perf-only), not worth the reshape trick.

    # ---- batch (sublane) tiling ----
    if tile_b is None:
        row_bytes = tile_f * max(m_bytes, o_bytes)
        tile_b = _round_down_clamped(_TARGET_TILE_BYTES // max(row_bytes, 1), sub_mult)
        # don't let one tile swallow the batch: keep >= ~8 grid steps when B allows
        cap = _round_up(pl.cdiv(B, _MIN_GRID_STEPS), sub_mult)
        tile_b = max(sub_mult, min(tile_b, cap))
    else:
        tile_b = _round_down_clamped(tile_b, sub_mult)   # clamp caller-provided tile
    tile_b = min(tile_b, _round_up(B, sub_mult))

    w2d = weight.reshape(1, F).astype(out_dtype)
    grid = (pl.cdiv(B, tile_b), pl.cdiv(F, tile_f))

    return pl.pallas_call(
        _msg_norm_kernel,
        out_shape=jax.ShapeDtypeStruct((B, F), out_dtype),
        grid_spec=pltpu.PrefetchScalarGridSpec(
            num_scalar_prefetch=0,
            grid=grid,
            in_specs=[
                pl.BlockSpec((1, tile_f), lambda i, j: (0, j)),        # weight row
                pl.BlockSpec((tile_b, tile_f), lambda i, j: (i, j)),   # message tile
            ],
            out_specs=pl.BlockSpec((tile_b, tile_f), lambda i, j: (i, j)),
        ),
        compiler_params=pltpu.CompilerParams(
            dimension_semantics=("parallel", "parallel"),
            vmem_limit_bytes=32 << 20,
        ),
    )(w2d, message)


class MessageNormalizerJAX:
    """Mirror of the PyTorch MessageNormalizer; deterministic init in-script."""

    def __init__(self, in_features, init_mean=1.0, init_stddev=0.01,
                 key=jax.random.PRNGKey(0)):
        self.in_features = in_features
        self.out_features = in_features
        # weight ~ N(init_mean, init_stddev), deterministic via PRNGKey.
        self.weight = (init_mean
                       + init_stddev * jax.random.normal(key, (in_features,),
                                                         dtype=jnp.float32))

    def __call__(self, message):
        F = message.shape[-1]
        assert F == self.in_features
        out_dtype = jnp.result_type(self.weight.dtype, message.dtype)

        total_bytes = message.size * jnp.dtype(message.dtype).itemsize
        if total_bytes < _SMALL_BYTES or F < _LANE:
            # Tiny or lane-sparse inputs: XLA's fused multiply is strictly
            # faster than a pallas_call launch + DMA for this much data.
            return self.weight.astype(out_dtype) * message.astype(out_dtype)

        m2d = message.reshape(-1, F)
        out = message_normalizer_2d(m2d, self.weight)
        return out.reshape(message.shape[:-1] + (F,))


if __name__ == "__main__":
    key = jax.random.PRNGKey(0)
    k_w, k_m, k_w2, k_m2 = jax.random.split(key, 4)

    # 1) Shape large enough to take the Pallas path (multi-step pipelined grid:
    #    B=1024, F=256 f32 -> tile_b=128, grid=(8, 1)).
    in_features = 256
    module = MessageNormalizerJAX(in_features, key=k_w)
    message = jax.random.normal(k_m, (1024, in_features), dtype=jnp.float32)
    out = jax.block_until_ready(module(message))
    ref = module.weight * message
    assert out.shape == message.shape
    assert jnp.allclose(out, ref, atol=1e-6, rtol=1e-6)

    # 2) Tiny shape with leading dims — exercises the plain-JAX fast path.
    small_mod = MessageNormalizerJAX(32, key=k_w2)
    small_msg = jax.random.normal(k_m2, (2, 4, 8, 32), dtype=jnp.float32)
    small_out = jax.block_until_ready(small_mod(small_msg))
    assert small_out.shape == small_msg.shape
    assert jnp.allclose(small_out, small_mod.weight * small_msg,
                        atol=1e-6, rtol=1e-6)

    print("KERNEL_OK")
</pallas_src>

<mosaic_0001>
module attributes {stable_mosaic.version = 11 : i64} {
  func.func @_msg_norm_kernel(%arg0: i32, %arg1: i32, %arg2: memref<1x256xf32, #tpu.memory_space<vmem>>, %arg3: memref<128x256xf32, #tpu.memory_space<vmem>>, %arg4: memref<128x256xf32, #tpu.memory_space<vmem>>) attributes {dimension_semantics = [#tpu.dimension_semantics<parallel>, #tpu.dimension_semantics<parallel>], iteration_bounds = array<i64: 8, 1>, scalar_prefetch = 0 : i64, scratch_operands = 0 : i64, tpu.core_type = #tpu.core_type<tc>, window_params = [{transform_indices = @transform_0, window_bounds = array<i64: 1, 256>}, {transform_indices = @transform_1, window_bounds = array<i64: 128, 256>}, {transform_indices = @transform_2, window_bounds = array<i64: 128, 256>}]} {
    %c0 = arith.constant 0 : index
    %c0_0 = arith.constant 0 : index
    %0 = vector.load %arg3[%c0, %c0_0] : memref<128x256xf32, #tpu.memory_space<vmem>>, vector<128x256xf32>
    %c0_1 = arith.constant 0 : index
    %c0_2 = arith.constant 0 : index
    %1 = vector.load %arg2[%c0_1, %c0_2] : memref<1x256xf32, #tpu.memory_space<vmem>>, vector<1x256xf32>
    %2 = vector.broadcast %1 : vector<1x256xf32> to vector<128x256xf32>
    %3 = arith.mulf %0, %2 : vector<128x256xf32>
    %c0_3 = arith.constant 0 : index
    %c0_4 = arith.constant 0 : index
    %4 = vector.load %arg4[%c0_3, %c0_4] : memref<128x256xf32, #tpu.memory_space<vmem>>, vector<128x256xf32>
    tpu.vector_store %arg4[%c0_3, %c0_4], %3 {strides = array<i32>} : memref<128x256xf32, #tpu.memory_space<vmem>>, vector<128x256xf32>,
    return
  }
  func.func @transform_0(%arg0: i32, %arg1: i32) -> (i32, i32) {
    %c0_i32 = arith.constant 0 : i32
    %c0_i32_0 = arith.constant 0 : i32
    return %c0_i32, %arg1 : i32, i32
  }
  func.func @transform_1(%arg0: i32, %arg1: i32) -> (i32, i32) {
    %c0_i32 = arith.constant 0 : i32
    return %arg0, %arg1 : i32, i32
  }
  func.func @transform_2(%arg0: i32, %arg1: i32) -> (i32, i32) {
    %c0_i32 = arith.constant 0 : i32
    return %arg0, %arg1 : i32, i32
  }
}

</mosaic_0001>

<bundles_post_ra>
// kernel: tpu_custom_call.1
= control target key start
LH: loop header
LB: loop body
LE: loop exit
PB: predicated region body
PF: predicated region fallthrough
CT: control target
= control target key end

     0   :  { %7 = vsyncpa [#allocation3], 0  ;;  %s983_s0 = inlined_call_operand.hbm [shape: f32[1,256], index: 0, kind: input, shape index: {}]   ;;  %s984_s1 = inlined_call_operand.hbm [shape: f32[1024,256], index: 1, kind: input, shape index: {}]   ;;  %s985_s2 = inlined_call_operand.hbm [shape: f32[1024,256], index: 2, kind: output, shape index: {}]  }
   0x1   :  { %8 = vsyncpa [#allocation6], 0 }
   0x2   :  { %10 = vsyncpa [#allocation6 + $0x1], 0 }
   0x3   :  { %11 = vsyncpa [#allocation4], 0 }
   0x4   :  { %13 = vsyncpa [#allocation4 + $0x1], 0  ;;  %s695_s9 = smov 0   ;;  %s697_s10 = smov 0  }
   0x5   :  { %s699_s11 = smov 0   ;;  %s701_s12 = smov 0  }
   0x6   :  { %s703_s13 = smov 0   ;;  %s705_s14 = smov 0  }
   0x7 LB: > { %s433_s15 = sadd.s32 4294967295, %s671_s14   ;;  %s434_s16 = sadd.s32 4294967294, %s671_s14   ;;  %s671_s14 = sphi %s705_s14, %s19_s14   ;;  %s667_s13 = sphi %s703_s13, %s1003_s13   ;;  %s663_s12 = sphi %s701_s12, %s1002_s12   ;;  %s659_s11 = sphi %s699_s11, %s1001_s11   ;;  %s655_s10 = sphi %s697_s10, %s1000_s10   ;;  %s651_s9 = sphi %s695_s9, %s999_s9  }
   0x8   : > { %s66_s17 = sadd.s32 1, %s659_s11  ;;  %p73_p0 = scmp.ne.s32.totalorder %s659_s11, %s655_s10 }
   0x9   : > { %p74_p1 = scmp.eq.s32.totalorder %s671_s14, 0  ;;  %p79_p2 = scmp.ne.s32.totalorder %s655_s10, %s651_s9 }
   0xa   : > { %p733_p3 = scmp.eq.s32.totalorder %s433_s15, 0  ;;  %p105_p4 = scmp.eq.s32.totalorder %s433_s15, 7 }
   0xb   : > { %p737_p5 = por %p74_p1, %p73_p0  ;;  %p111_p6 = scmp.eq.s32.totalorder %s434_s16, 7 }
   0xc   : > { %p743_p7 = por %p733_p3, %p79_p2  ;;  %p747_p8 = por %p105_p4, %p73_p0 }
   0xd   : > { %p751_p9 = por %p111_p6, %p79_p2  ;;  %p435_p10 = scmp.ge.s32.totalorder %s671_s14, 1 }
   0xe   : > { %s990_s20 = scalar_select %p743_p7, 1, 0 }
   0xf   : > { %s991_s21 = scalar_select %p747_p8, 1, 0 }
  0x10   : > { %s992_s22 = scalar_select %p751_p9, 1, 0 }
  0x11   : > { %p118_p11 = scmp.lt.s32.totalorder %s671_s14, 9  ;;  %s673_s24 = smov [#allocation2]  }
  0x12   : > { %s134_s25 = sshll.u32 %s673_s24, 4  ;;  %p477_p13 = scmp.lt.s32.totalorder %s671_s14, 8  ;;  %s135_s25 = int_to_ptr.vmem [resolvable:$true] %s134_s25 }
  0x13   : > { %p757_p12 = pnand %p435_p10, %p118_p11  ;;  %s31_s28 = sadd.s32 1, %s667_s13 }
  0x14   : > { %p766_p1 = pnand %p477_p13, %p737_p5  ;;  %p33_p4 = scmp.ge.s32.totalorder %s31_s28, 8 }
  0x15   : > { %p464_p0 = pneg %p757_p12  ;;  %s145_s29 = sand.u32 1, %s659_s11  }
  0x16   : > { %s544_s30 = scalar_lea.vmem %s135_s25, 32  ;;  %p552_p8 = scmp.lt.s32.totalorder %s135_s25, %s135_s25 }
  0x17   : > { %p772_p2 = pnand %p464_p0, %p733_p3  ;;  %p545_p10 = scmp.ne.s32.totalorder %s135_s25, %s544_s30 }
  0x18   : > { %p553_p5 = scmp.lt.s32.totalorder %s544_s30, %s544_s30 }
  0x19   : > { %p535_p6 = pneg %p772_p2 }
  0x1a   : > { %p554_p13 = por %p553_p5, %p552_p8 }
  0x1b   : > { %p547_p11 = pnand %p545_p10, %p535_p6 }
  0x1d   : > { %p548_p9 = pneg %p547_p11 }
  0x1f   : > { %p555_p7 = pnand %p554_p13, %p548_p9 }
  0x21   : > { %558 = shalt.err (!%p555_p7)
}
  0x22   : > { %467 = dma.hbm_to_vmem [thread:$0]  (!%p772_p2), %s983_s0, 32, %s135_s25, [#allocation3]  }
  0x23   : > { %s1005_s28 = smov (%p33_p4, %s31_s28), 0  ;;  %s438_s5 = sshll.u32 %s145_s29, 8 }
  0x24   : > { %s61_s6 = ssub.s32 %s667_s13, %s1005_s28  ;;  %s453_s7 = sshll.u32 %s667_s13, 12 }
  0x25   : > { %p64_p0 = scmp.eq.s32.totalorder %s61_s6, 0  ;;  %s158_s16 = scalar_lea.hbm %s984_s1, %s453_s7 }
  0x26   : > { %s149_s19 = scalar_lea.vmem [#allocation5], %s438_s5  ;;  %s146_s30 = scalar_lea.sflag [#allocation6], %s145_s29 }
  0x27   : > { %s159_s24 = sshll.u32 %s149_s19, 4  ;;  %p561_p7 = pneg %p766_p1  ;;  %s160_s24 = int_to_ptr.vmem [resolvable:$true] %s159_s24 }
  0x28   : > { %s796_s27 = scalar_select %p64_p0, %s659_s11, %s66_s17  }
  0x29   : > { %s572_s25 = scalar_lea.vmem %s160_s24, 4096  ;;  %s674_s3 = smov [#allocation5]  }
  0x2a   : > { %p573_p8 = scmp.ne.s32.totalorder %s160_s24, %s572_s25  ;;  %s577_s4 = sshll.u32 %s674_s3, 4  ;;  %s578_s4 = int_to_ptr.vmem [resolvable:$false] %s577_s4 }
  0x2b   : > { %s579_s6 = scalar_lea.vmem %s578_s4, 8192  ;;  %p580_p4 = scmp.lt.s32.totalorder %s160_s24, %s578_s4 }
  0x2c   : > { %p575_p9 = pnand %p573_p8, %p561_p7  ;;  %p581_p6 = scmp.lt.s32.totalorder %s579_s6, %s572_s25 }
  0x2e   : > { %p576_p2 = pneg %p575_p9  ;;  %p582_p10 = por %p581_p6, %p580_p4 }
  0x30   : > { %p583_p11 = pnand %p582_p10, %p576_p2 }
  0x32   : > { %586 = shalt.err (!%p583_p11)
}
  0x33   : > { %s675_s5 = smov 256   ;;  %s676_s17 = smov 16  }
  0x34   : > { %471 = dma.hbm_to_vmem [thread:$0]  (!%p766_p1), %s158_s16, 4096, %s160_s24, %s146_s30, %s675_s5, %s675_s5, %s676_s17  }
  0x35   : > { %171 = sbr.rel (%p757_p12) target bundleno = 102 (0x66), region = 28 }
  0x3a   : > { %638 = dma.done.wait (%p733_p3), [#allocation3], 32  }
  0x3b   : > { %640 = vsyncadd (%p733_p3), [#allocation3], 4294967264  ;;  %s809_s29 = sand.u32 1, %s655_s10   ;;  %p996_p1 = scmp.ne.s32.totalorder %s990_s20, 0 }
  0x3c   : > { %s444_s7 = sshll.u32 %s809_s29, 8  ;;  %s178_s8 = scalar_lea.sflag [#allocation6], %s809_s29 }
  0x3d   : > { %s815_s26 = scalar_lea.vmem [#allocation5], %s444_s7 }
  0x3e   : > { %642 = dma.done.wait (%p996_p1), %s178_s8, 4096  }
  0x3f   : > { %644 = vsyncadd (%p996_p1), %s178_s8, 4294963200  ;;  %v241_v0 = vlaneseq  ;;  %v207_v4 = vld [vmem:[%s815_s26] sm:$0xff]  ;;  %v239_v5 = vld [vmem:[#allocation2] sm:$0x3]  ;;  %s849_s18 = scalar_lea.vmem [#allocation7], %s444_s7  ;;  %s455_s20 = sshll.u32 %s663_s12, 12 }
  0x40   : > { %v208_v6 = vld [vmem:[%s815_s26 + $0x8] sm:$0xff]  ;;  %v209_v9 = vld [vmem:[%s815_s26 + $0x10] sm:$0xff]  ;;  %v210_v10 = vld [vmem:[%s815_s26 + $0x18] sm:$0xff]  ;;  %s332_s23 = sshll.u32 %s849_s18, 4  ;;  %s920_s19 = scalar_lea.hbm %s985_s2, %s455_s20  ;;  %s924_s23 = int_to_ptr.vmem [resolvable:$true] %s332_s23 }
  0x41   : > { %v242_v1 = vshrl.u32 %v241_v0, 7  ;;  %v211_v11 = vld [vmem:[%s815_s26 + $0x20] sm:$0xff]  ;;  %v212_v12 = vld [vmem:[%s815_s26 + $0x28] sm:$0xff]  ;;  %v213_v13 = vld [vmem:[%s815_s26 + $0x30] sm:$0xff]  ;;  %s316_s12 = scalar_lea.sflag [#allocation4], %s809_s29  ;;  %s587_s24 = scalar_lea.vmem %s924_s23, 4096 }
  0x42   : > { %v214_v14 = vld [vmem:[%s815_s26 + $0x38] sm:$0xff]  ;;  %v215_v19 = vld [vmem:[%s815_s26 + $0x40] sm:$0xff]  ;;  %v216_v20 = vld [vmem:[%s815_s26 + $0x48] sm:$0xff]  ;;  %p588_p3 = scmp.ne.s32.totalorder %s924_s23, %s587_s24  ;;  %p997_p12 = scmp.ne.s32.totalorder %s991_s21, 0 }
  0x43   : > { %v243_v2 = vsub.s32 0, %v242_v1  ;;  %v247_v3 = vsub.s32 1, %v242_v1  ;;  %v217_v21 = vld [vmem:[%s815_s26 + $0x50] sm:$0xff]  ;;  %v218_v26 = vld [vmem:[%s815_s26 + $0x58] sm:$0xff]  ;;  %v219_v27 = vld [vmem:[%s815_s26 + $0x60] sm:$0xff]  ;;  %s677_s30 = smov [#allocation7]  }
  0x44   : > { %v220_v28 = vld [vmem:[%s815_s26 + $0x68] sm:$0xff]  ;;  %v221_v33 = vld [vmem:[%s815_s26 + $0x70] sm:$0xff]  ;;  %v222_v34 = vld [vmem:[%s815_s26 + $0x78] sm:$0xff]  ;;  %p589_p5 = pnand %p588_p3, %p997_p12  ;;  %s591_s25 = sshll.u32 %s677_s30, 4  ;;  %s592_s25 = int_to_ptr.vmem [resolvable:$false] %s591_s25 }
  0x45   : > { %v823_v7 = vrot.slane %v239_v5, %v243_v2  ;;  %v825_v8 = vrot.slane %v239_v5, %v247_v3  ;;  %v223_v35 = vld [vmem:[%s815_s26 + $0x80] sm:$0xff]  ;;  %v224_v40 = vld [vmem:[%s815_s26 + $0x88] sm:$0xff]  ;;  %v225_v41 = vld [vmem:[%s815_s26 + $0x90] sm:$0xff]  ;;  %s593_s3 = scalar_lea.vmem %s592_s25, 8192  ;;  %p594_p0 = scmp.lt.s32.totalorder %s924_s23, %s592_s25 }
  0x46   : > { %v226_v42 = vld [vmem:[%s815_s26 + $0x98] sm:$0xff]  ;;  %v227_v47 = vld [vmem:[%s815_s26 + $0xa0] sm:$0xff]  ;;  %v228_v48 = vld [vmem:[%s815_s26 + $0xa8] sm:$0xff]  ;;  %p590_p13 = pneg %p589_p5  ;;  %p595_p7 = scmp.lt.s32.totalorder %s593_s3, %s587_s24 }
  0x47   : > { %v251_v15 = vmul.f32 %v823_v7, %v207_v4  ;;  %v252_v16 = vmul.f32 %v825_v8, %v208_v6  ;;  %v253_v17 = vmul.f32 %v823_v7, %v209_v9  ;;  %v254_v18 = vmul.f32 %v825_v8, %v210_v10  ;;  %v229_v49 = vld [vmem:[%s815_s26 + $0xb0] sm:$0xff]  ;;  %v230_v53 = vld [vmem:[%s815_s26 + $0xb8] sm:$0xff]  ;;  %v231_v54 = vld [vmem:[%s815_s26 + $0xc0] sm:$0xff] }
  0x48   : > { %v255_v22 = vmul.f32 %v823_v7, %v211_v11  ;;  %v256_v23 = vmul.f32 %v825_v8, %v212_v12  ;;  %v257_v24 = vmul.f32 %v823_v7, %v213_v13  ;;  %v258_v25 = vmul.f32 %v825_v8, %v214_v14  ;;  %v232_v55 = vld [vmem:[%s815_s26 + $0xc8] sm:$0xff]  ;;  %v233_v59 = vld [vmem:[%s815_s26 + $0xd0] sm:$0xff]  ;;  %v234_v60 = vld [vmem:[%s815_s26 + $0xd8] sm:$0xff]  ;;  %p596_p8 = por %p595_p7, %p594_p0 }
  0x49   : > { %283 = vst [vmem:[%s849_s18] sm:$0xff] %v251_v15  ;;  %284 = vst [vmem:[%s849_s18 + $0x8] sm:$0xff] %v252_v16  ;;  %v259_v29 = vmul.f32 %v823_v7, %v215_v19  ;;  %v260_v30 = vmul.f32 %v825_v8, %v216_v20  ;;  %v261_v31 = vmul.f32 %v823_v7, %v217_v21  ;;  %v235_v61 = vld [vmem:[%s815_s26 + $0xe0] sm:$0xff]  ;;  %v236_v1 = vld [vmem:[%s815_s26 + $0xe8] sm:$0xff] }
  0x4a   : > { %285 = vst [vmem:[%s849_s18 + $0x10] sm:$0xff] %v253_v17  ;;  %286 = vst [vmem:[%s849_s18 + $0x18] sm:$0xff] %v254_v18  ;;  %v262_v32 = vmul.f32 %v825_v8, %v218_v26  ;;  %v263_v36 = vmul.f32 %v823_v7, %v219_v27  ;;  %v264_v37 = vmul.f32 %v825_v8, %v220_v28  ;;  %v237_v2 = vld [vmem:[%s815_s26 + $0xf0] sm:$0xff]  ;;  %v238_v3 = vld [vmem:[%s815_s26 + $0xf8] sm:$0xff]  ;;  %p597_p9 = pnand %p596_p8, %p590_p13 }
  0x4b   : > { %287 = vst [vmem:[%s849_s18 + $0x20] sm:$0xff] %v255_v22  ;;  %288 = vst [vmem:[%s849_s18 + $0x28] sm:$0xff] %v256_v23  ;;  %v265_v38 = vmul.f32 %v823_v7, %v221_v33  ;;  %v266_v39 = vmul.f32 %v825_v8, %v222_v34  ;;  %v267_v43 = vmul.f32 %v823_v7, %v223_v35 }
  0x4c   : > { %289 = vst [vmem:[%s849_s18 + $0x30] sm:$0xff] %v257_v24  ;;  %290 = vst [vmem:[%s849_s18 + $0x38] sm:$0xff] %v258_v25  ;;  %v268_v44 = vmul.f32 %v825_v8, %v224_v40  ;;  %v269_v45 = vmul.f32 %v823_v7, %v225_v41  ;;  %v270_v46 = vmul.f32 %v825_v8, %v226_v42 }
  0x4d   : > { %291 = vst [vmem:[%s849_s18 + $0x40] sm:$0xff] %v259_v29  ;;  %292 = vst [vmem:[%s849_s18 + $0x48] sm:$0xff] %v260_v30  ;;  %v271_v50 = vmul.f32 %v823_v7, %v227_v47  ;;  %v272_v51 = vmul.f32 %v825_v8, %v228_v48  ;;  %v273_v52 = vmul.f32 %v823_v7, %v229_v49 }
  0x4e   : > { %293 = vst [vmem:[%s849_s18 + $0x50] sm:$0xff] %v261_v31  ;;  %294 = vst [vmem:[%s849_s18 + $0x58] sm:$0xff] %v262_v32  ;;  %v274_v56 = vmul.f32 %v825_v8, %v230_v53  ;;  %v275_v57 = vmul.f32 %v823_v7, %v231_v54  ;;  %v276_v58 = vmul.f32 %v825_v8, %v232_v55 }
  0x4f   : > { %295 = vst [vmem:[%s849_s18 + $0x60] sm:$0xff] %v263_v36  ;;  %296 = vst [vmem:[%s849_s18 + $0x68] sm:$0xff] %v264_v37  ;;  %v277_v62 = vmul.f32 %v823_v7, %v233_v59  ;;  %v278_v63 = vmul.f32 %v825_v8, %v234_v60  ;;  %v279_v0 = vmul.f32 %v823_v7, %v235_v61 }
  0x50   : > { %297 = vst [vmem:[%s849_s18 + $0x70] sm:$0xff] %v265_v38  ;;  %298 = vst [vmem:[%s849_s18 + $0x78] sm:$0xff] %v266_v39  ;;  %v280_v4 = vmul.f32 %v825_v8, %v236_v1  ;;  %v281_v5 = vmul.f32 %v823_v7, %v237_v2  ;;  %v282_v6 = vmul.f32 %v825_v8, %v238_v3 }
  0x51   : > { %299 = vst [vmem:[%s849_s18 + $0x80] sm:$0xff] %v267_v43  ;;  %300 = vst [vmem:[%s849_s18 + $0x88] sm:$0xff] %v268_v44 }
  0x52   : > { %301 = vst [vmem:[%s849_s18 + $0x90] sm:$0xff] %v269_v45  ;;  %302 = vst [vmem:[%s849_s18 + $0x98] sm:$0xff] %v270_v46 }
  0x53   : > { %303 = vst [vmem:[%s849_s18 + $0xa0] sm:$0xff] %v271_v50  ;;  %304 = vst [vmem:[%s849_s18 + $0xa8] sm:$0xff] %v272_v51 }
  0x54   : > { %305 = vst [vmem:[%s849_s18 + $0xb0] sm:$0xff] %v273_v52  ;;  %306 = vst [vmem:[%s849_s18 + $0xb8] sm:$0xff] %v274_v56 }
  0x55   : > { %307 = vst [vmem:[%s849_s18 + $0xc0] sm:$0xff] %v275_v57  ;;  %308 = vst [vmem:[%s849_s18 + $0xc8] sm:$0xff] %v276_v58 }
  0x56   : > { %309 = vst [vmem:[%s849_s18 + $0xd0] sm:$0xff] %v277_v62  ;;  %310 = vst [vmem:[%s849_s18 + $0xd8] sm:$0xff] %v278_v63 }
  0x57   : > { %311 = vst [vmem:[%s849_s18 + $0xe0] sm:$0xff] %v279_v0  ;;  %312 = vst [vmem:[%s849_s18 + $0xe8] sm:$0xff] %v280_v4 }
  0x58   : > { %313 = vst [vmem:[%s849_s18 + $0xf0] sm:$0xff] %v281_v5  ;;  %314 = vst [vmem:[%s849_s18 + $0xf8] sm:$0xff] %v282_v6 }
  0x59   : > { %600 = shalt.err (!%p597_p9)
}
  0x5a   : > { %s601_s4 = scalar_lea.hbm %s920_s19, 4096  ;;  %s605_s17 = scalar_lea.hbm %s985_s2, 32768 }
  0x5b   : > { %p602_p2 = scmp.ne.s32.totalorder %s920_s19, %s601_s4  ;;  %p606_p10 = scmp.lt.s32.totalorder %s920_s19, %s985_s2 }
  0x5c   : > { %p607_p11 = scmp.lt.s32.totalorder %s605_s17, %s601_s4 }
  0x5d   : > { %p603_p4 = pnand %p602_p2, %p997_p12 }
  0x5e   : > { %p608_p1 = por %p607_p11, %p606_p10 }
  0x5f   : > { %p604_p6 = pneg %p603_p4 }
  0x61   : > { %p609_p3 = pnand %p608_p1, %p604_p6 }
  0x63   : > { %612 = shalt.err (!%p609_p3)
}
  0x64   : > { %s678_s26 = smov 256   ;;  %s679_s18 = smov 16  }
  0x65   : > { %462 = dma.vmem_to_hbm [thread:$0]  (%p997_p12), %s924_s23, 4096, %s920_s19, %s316_s12, %s678_s26, %s678_s26, %s679_s18  }
  0x66 PF: > { %p479_p5 = scmp.ge.s32.totalorder %s671_s14, 2  ;;  %s347_s20 = sand.u32 1, %s651_s9  }
  0x67   : > { %p998_p13 = scmp.ne.s32.totalorder %s992_s22, 0  ;;  %s348_s15 = scalar_lea.sflag [#allocation4], %s347_s20 }
  0x69   : > { %p473_p0 = pnand %p479_p5, %p998_p13 }
  0x6b   : > { %p474_p7 = pneg %p473_p0 }
  0x6d   : > { %646 = dma.done.wait (%p474_p7), %s348_s15, 4096  }
  0x6e   : > { %648 = vsyncadd (%p474_p7), %s348_s15, 4294963200  ;;  %s19_s14 = sadd.s32 1, %s671_s14   ;;  %s999_s9 = smov %s655_s10 }
  0x6f   : > { %p16_p8 = scmp.ge.s32.totalorder %s19_s14, 10   ;;  %s1000_s10 = smov %s659_s11 }
  0x70   : > { %s1001_s11 = smov %s796_s27  ;;  %s1002_s12 = smov %s667_s13 }
  0x71   : > { %s1003_s13 = smov %s1005_s28  ;;  %18 = sbr.rel (!%p16_p8) target bundleno = 7 (0x7), region = 79 }
  0x76   :  { %353 = vsyncpa [#allocation3], 1 }
  0x77   :  { %355 = vsyncpa [#allocation3 + $0x1], 1 }
  0x78   :  { %356 = vsyncpa [#allocation6], 1 }
  0x79   :  { %358 = vsyncpa [#allocation6 + $0x1], 1 }
  0x7a   :  { %359 = vsyncpa [#allocation4], 1 }
  0x7b   :  { %361 = vsyncpa [#allocation4 + $0x1], 1 }

</bundles_post_ra>
